<compile_context>
chip_gen: v5e
topology: v5e:2x2
jax: 0.10.0
libtpu: 0.0.40
codegen_flags: <defaults>
</compile_context>

<pallas_src>
import functools

import jax
import jax.numpy as jnp
from jax.experimental import pallas as pl
from jax.experimental.pallas import tpu as pltpu


def _round_up(a, m):
    return (a + m - 1) // m * m


def _vmem_capacity_bytes():
    """Per-core VMEM capacity; conservative (v7x per-TC) fallback."""
    try:
        info = pltpu.get_tpu_info()
        cap = getattr(info, "vmem_capacity_bytes", None)
        if cap:
            return int(cap)
    except Exception:
        pass
    return 64 << 20


def _pick_tile_n(n, k, d, vmem_cap):
    """Row-tile size sized from the real per-core VMEM, minus the resident codebook."""
    budget = vmem_cap // 2                      # headroom for compiler scratch etc.
    resident = 2 * 4 * (k * d + k)              # -2*E and ||e||^2, double-buffered
    avail = max(budget - resident, 1 << 20)
    # per-row f32 bytes: streamed x/q (double-buffered) + f32 x/q live in-body
    # + ~4 live [*, K] intermediates (xe2/d2, iota, one-hot)
    per_row = 4 * (6 * d + 4 * k)
    tile = avail // max(per_row, 1)
    tile = max(8, min(int(tile), 1024))
    tile = min(tile, _round_up(max(n, 1), 8))
    if tile >= 256:
        tile = (tile // 256) * 256              # feed the 256-wide MXU (v6e/v7x)
    else:
        tile = (tile // 8) * 8
    return max(int(tile), 8)


def _vq_kernel(x_ref, em2_ref, esq_ref, q_ref, loss_ref, *, n_valid, mxu_dtype):
    # x_ref:   [T, D]   tile of flattened inputs (original dtype, upcast here)
    # em2_ref: [K, D]   f32, -2 * codebook (VMEM-resident across the grid)
    # esq_ref: [1, K]   f32 ||e||^2 (VMEM-resident)
    # q_ref:   [T, D]   quantized output tile (x.dtype)
    # loss_ref:[8, 128] per-tile partial sum of squared error (broadcast scalar)
    x = x_ref[...].astype(jnp.float32)                      # [T, D]
    em2 = em2_ref[...]                                       # [K, D] == -2 * E

    # d2 = ||e||^2 - 2 x.E^T   (||x||^2 dropped: argmin-invariant).  The -2 is
    # folded into the codebook operand, so only one VPU add over [T, K] remains.
    xe2 = jax.lax.dot_general(
        x.astype(mxu_dtype), em2.astype(mxu_dtype),
        dimension_numbers=(((1,), (1,)), ((), ())),          # contract D on both
        preferred_element_type=jnp.float32)                  # [T, K]
    d2 = esq_ref[...] + xe2

    idx = jnp.argmin(d2, axis=1)                              # [T] (first-min ties)

    # Gather winning rows with a (-0.5)-valued one-hot against (-2*E): the two
    # power-of-two scales cancel exactly, so q holds the exact codebook rows.
    cols = jax.lax.broadcasted_iota(jnp.int32, d2.shape, 1)   # [T, K]
    sel = jnp.where(cols == idx[:, None], jnp.float32(-0.5), jnp.float32(0.0))
    q = jnp.dot(sel, em2, preferred_element_type=jnp.float32)  # [T, D]

    q_ref[...] = q.astype(q_ref.dtype)

    # Per-tile partial loss; rows past the true N (partial last tile) are
    # masked.  (q - x)^2 keeps parity with the PyTorch loss; the cheaper
    # ||x||^2 + row-min(d2) form loses precision when q ~= x, so it is not used.
    t = x.shape[0]
    row = pl.program_id(0) * t + jax.lax.broadcasted_iota(jnp.int32, (t, 1), 0)
    diff = jnp.where(row < n_valid, q - x, 0.0)
    loss_ref[...] = jnp.full(loss_ref.shape, jnp.sum(diff * diff), loss_ref.dtype)


def vector_quantizer_forward(x, embedding, commitment_cost=0.25,
                             mxu_dtype=jnp.float32):
    """x: [B, S, D], embedding: [K, D] -> (quantized [B, S, D], loss scalar).

    Forward semantics of the PyTorch VectorQuantizer: quantized forward value is
    the nearest codebook row; loss = q_latent_loss + commitment_cost * e_latent_loss
    = (1 + commitment_cost) * mean((q - x)^2) in the forward pass.
    """
    B, S, D = x.shape
    K, D2 = embedding.shape
    assert D == D2
    N = B * S

    vmem_cap = _vmem_capacity_bytes()
    tile_n = _pick_tile_n(N, K, D, vmem_cap)
    num_tiles = -(-N // tile_n)
    # NOTE: for very large K*D (resident codebook + [T, K] intermediates nearing
    # the per-core VMEM budget, esp. v7x's 64 MiB), add a second "arbitrary"
    # K-tile grid axis with a running (min, argmin) carry in VMEM scratch.

    x2d = x.reshape(N, D)                        # free view, no HBM pass
    e32 = embedding.astype(jnp.float32)
    em2 = (-2.0) * e32                           # tiny & hoisted: folds -2 into the MXU
    e_sq = jnp.sum(e32 * e32, axis=1)[None, :]   # [1, K]

    kernel = functools.partial(_vq_kernel, n_valid=N, mxu_dtype=mxu_dtype)

    # VMEM accounting: streamed x/q tiles (double-buffered), the resident
    # codebook (+||e||^2, double-buffered by the pipeline; pl.Buffered(1) would
    # halve this but is not required to fit), and live in-body intermediates.
    itemsize = jnp.dtype(x.dtype).itemsize
    vmem_need = (2 * 2 * itemsize * tile_n * D      # x in + q out, double-buffered
                 + 2 * 4 * (K * D + K)              # -2*E + ||e||^2, double-buffered
                 + 4 * 4 * tile_n * K               # xe2/d2, iota, one-hot
                 + 2 * 4 * tile_n * D               # f32 x and q inside the body
                 + 2 * 4 * 8 * 128)                 # loss partial block
    vmem_limit = int(min(max(int(1.25 * vmem_need), 16 << 20),
                         int(vmem_cap * 0.85)))     # <= ~54 MiB on v7x, ~108 MiB on v5e/v6e

    q2d, loss_parts = pl.pallas_call(
        kernel,
        out_shape=(
            jax.ShapeDtypeStruct((N, D), x.dtype),
            jax.ShapeDtypeStruct((num_tiles * 8, 128), jnp.float32),
        ),
        grid=(num_tiles,),
        in_specs=[
            pl.BlockSpec((tile_n, D), lambda i: (i, 0)),   # x tile (streamed)
            pl.BlockSpec((K, D), lambda i: (0, 0)),        # -2*codebook (VMEM-resident)
            pl.BlockSpec((1, K), lambda i: (0, 0)),        # ||e||^2 (VMEM-resident)
        ],
        out_specs=(
            pl.BlockSpec((tile_n, D), lambda i: (i, 0)),   # quantized tile
            pl.BlockSpec((8, 128), lambda i: (i, 0)),      # per-tile loss partial
        ),
        compiler_params=pltpu.CompilerParams(
            dimension_semantics=("parallel",),
            vmem_limit_bytes=vmem_limit,
        ),
        cost_estimate=pl.CostEstimate(
            flops=2 * 2 * N * K * D,
            transcendentals=0,
            bytes_accessed=2 * itemsize * N * D + 4 * (K * D + K),
        ),
    )(x2d, em2, e_sq)

    quantized = q2d.reshape(B, S, D)             # contiguous -> free reshape
    loss_sum = jnp.sum(loss_parts.reshape(num_tiles, 8, 128)[:, 0, 0])
    loss = (1.0 + commitment_cost) * (loss_sum / jnp.float32(N * D))

    # Straight-through estimator: forward value x + (q - x).detach() == q.
    # TODO(synk): add jax.custom_vjp for straight-through / commitment gradient semantics if used in training.
    return quantized, loss


if __name__ == "__main__":
    num_embeddings = 64
    embedding_dim = 32
    commitment_cost = 0.25
    B, S = 2, 8

    key = jax.random.PRNGKey(0)
    kx, ke = jax.random.split(key)
    x = jax.random.normal(kx, (B, S, embedding_dim), dtype=jnp.float32)
    # nn.init.uniform_(embedding.weight, -0.1, 0.1)
    embedding = jax.random.uniform(
        ke, (num_embeddings, embedding_dim), dtype=jnp.float32, minval=-0.1, maxval=0.1
    )

    quantized, loss = vector_quantizer_forward(x, embedding, commitment_cost)
    quantized = jax.block_until_ready(quantized)
    loss = jax.block_until_ready(loss)

    # Pure-JAX reference check (mirrors the PyTorch forward)
    flat_x = x.reshape(-1, embedding_dim)
    d = jnp.sqrt(
        jnp.maximum(
            jnp.sum(flat_x**2, -1, keepdims=True)
            - 2.0 * flat_x @ embedding.T
            + jnp.sum(embedding**2, -1)[None, :],
            0.0,
        )
    )
    idx_ref = jnp.argmin(d, axis=1)
    q_ref = embedding[idx_ref].reshape(B, S, embedding_dim)
    loss_ref = (1.0 + commitment_cost) * jnp.mean((q_ref - x) ** 2)

    assert jnp.allclose(quantized, q_ref, atol=1e-5), "quantized mismatch"
    assert jnp.allclose(loss, loss_ref, atol=1e-5), "loss mismatch"

    print("KERNEL_OK")
</pallas_src>

<mosaic_0001>
module attributes {stable_mosaic.version = 11 : i64} {
  func.func @_vq_kernel(%arg0: i32, %arg1: memref<16x32xf32, #tpu.memory_space<vmem>>, %arg2: memref<64x32xf32, #tpu.memory_space<vmem>>, %arg3: memref<1x64xf32, #tpu.memory_space<vmem>>, %arg4: memref<16x32xf32, #tpu.memory_space<vmem>>, %arg5: memref<8x128xf32, #tpu.memory_space<vmem>>) attributes {dimension_semantics = [#tpu.dimension_semantics<parallel>], iteration_bounds = array<i64: 1>, scalar_prefetch = 0 : i64, scratch_operands = 0 : i64, tpu.core_type = #tpu.core_type<tc>, window_params = [{transform_indices = @transform_0, window_bounds = array<i64: 16, 32>}, {pipeline_mode = #tpu.pipeline_mode<synchronous>, transform_indices = @transform_1, window_bounds = array<i64: 64, 32>}, {pipeline_mode = #tpu.pipeline_mode<synchronous>, transform_indices = @transform_2, window_bounds = array<i64: 1, 64>}, {transform_indices = @transform_3, window_bounds = array<i64: 16, 32>}, {transform_indices = @transform_4, window_bounds = array<i64: 8, 128>}]} {
    %c0 = arith.constant 0 : index
    %c0_0 = arith.constant 0 : index
    %0 = vector.load %arg1[%c0, %c0_0] : memref<16x32xf32, #tpu.memory_space<vmem>>, vector<16x32xf32>
    %c0_1 = arith.constant 0 : index
    %c0_2 = arith.constant 0 : index
    %1 = vector.load %arg2[%c0_1, %c0_2] : memref<64x32xf32, #tpu.memory_space<vmem>>, vector<64x32xf32>
    %cst = arith.constant dense<0.000000e+00> : vector<16x64xf32>
    %2 = tpu.matmul %0, %1, %cst {dimension_numbers = #tpu.dot_dimension_numbers<[1], [1], [0], [0], [0, 0, 1, 0], [], []>} : vector<16x32xf32>, vector<64x32xf32>, vector<16x64xf32> -> vector<16x64xf32>
    %c0_3 = arith.constant 0 : index
    %c0_4 = arith.constant 0 : index
    %3 = vector.load %arg3[%c0_3, %c0_4] : memref<1x64xf32, #tpu.memory_space<vmem>>, vector<1x64xf32>
    %4 = vector.broadcast %3 : vector<1x64xf32> to vector<16x64xf32>
    %5 = arith.addf %4, %2 : vector<16x64xf32>
    %6 = tpu.reduce_index %5 {axis = 1 : i32, kind = #tpu.reduction_kind<arg_min>} : vector<16x64xf32> -> vector<16xi32>
    %7 = tpu.iota {dimensions = array<i32: 1>} : vector<16x64xi32>
    %8 = vector.shape_cast %6 : vector<16xi32> to vector<16x1xi32>
    %9 = vector.broadcast %8 : vector<16x1xi32> to vector<16x64xi32>
    %10 = arith.cmpi eq, %7, %9 : vector<16x64xi32>
    %cst_5 = arith.constant -5.000000e-01 : f32
    %cst_6 = arith.constant 0.000000e+00 : f32
    %11 = vector.broadcast %cst_5 : f32 to vector<16x64xf32>
    %12 = vector.broadcast %cst_6 : f32 to vector<16x64xf32>
    %13 = arith.select %10, %11, %12 : vector<16x64xi1>, vector<16x64xf32>
    %cst_7 = arith.constant dense<0.000000e+00> : vector<16x32xf32>
    %14 = tpu.matmul %13, %1, %cst_7 {dimension_numbers = #tpu.dot_dimension_numbers<[1], [0], [0], [1], [0, 0, 1, 1], [], []>} : vector<16x64xf32>, vector<64x32xf32>, vector<16x32xf32> -> vector<16x32xf32>
    %c0_8 = arith.constant 0 : index
    %c0_9 = arith.constant 0 : index
    %15 = vector.load %arg4[%c0_8, %c0_9] : memref<16x32xf32, #tpu.memory_space<vmem>>, vector<16x32xf32>
    tpu.vector_store %arg4[%c0_8, %c0_9], %14 {strides = array<i32>} : memref<16x32xf32, #tpu.memory_space<vmem>>, vector<16x32xf32>,
    %c16_i32 = arith.constant 16 : i32
    %16 = arith.muli %arg0, %c16_i32 : i32
    %17 = tpu.iota {dimensions = array<i32: 0>} : vector<16x1xi32>
    %18 = vector.broadcast %16 : i32 to vector<16x1xi32>
    %19 = arith.addi %18, %17 : vector<16x1xi32>
    %c16_i32_10 = arith.constant 16 : i32
    %20 = vector.broadcast %c16_i32_10 : i32 to vector<16x1xi32>
    %21 = arith.cmpi slt, %19, %20 : vector<16x1xi32>
    %22 = arith.subf %14, %0 : vector<16x32xf32>
    %cst_11 = arith.constant 0.000000e+00 : f32
    %23 = vector.shape_cast %21 : vector<16x1xi1> to vector<16x1xi1>
    %24 = vector.broadcast %23 : vector<16x1xi1> to vector<16x32xi1>
    %25 = vector.broadcast %cst_11 : f32 to vector<16x32xf32>
    %26 = arith.select %24, %22, %25 : vector<16x32xi1>, vector<16x32xf32>
    %27 = arith.mulf %26, %26 : vector<16x32xf32>
    %28 = vector.shape_cast %27 : vector<16x32xf32> to vector<1x16x32xf32>
    %cst_12 = arith.constant dense<0.000000e+00> : vector<1xf32>
    %29 = vector.multi_reduction <add>, %28, %cst_12 [1, 2] : vector<1x16x32xf32> to vector<1xf32>
    %30 = vector.shape_cast %29 : vector<1xf32> to vector<1x1x1xf32>
    %31 = vector.extract %30[0, 0, 0] : f32 from vector<1x1x1xf32>
    %32 = vector.broadcast %31 : f32 to vector<8x128xf32>
    %c0_13 = arith.constant 0 : index
    %c0_14 = arith.constant 0 : index
    %33 = vector.load %arg5[%c0_13, %c0_14] : memref<8x128xf32, #tpu.memory_space<vmem>>, vector<8x128xf32>
    tpu.vector_store %arg5[%c0_13, %c0_14], %32 {strides = array<i32>} : memref<8x128xf32, #tpu.memory_space<vmem>>, vector<8x128xf32>,
    return
  }
  func.func @transform_0(%arg0: i32) -> (i32, i32) {
    %c0_i32 = arith.constant 0 : i32
    %c0_i32_0 = arith.constant 0 : i32
    return %arg0, %c0_i32 : i32, i32
  }
  func.func @transform_1(%arg0: i32) -> (i32, i32) {
    %c0_i32 = arith.constant 0 : i32
    %c0_i32_0 = arith.constant 0 : i32
    %c0_i32_1 = arith.constant 0 : i32
    return %c0_i32, %c0_i32_0 : i32, i32
  }
  func.func @transform_2(%arg0: i32) -> (i32, i32) {
    %c0_i32 = arith.constant 0 : i32
    %c0_i32_0 = arith.constant 0 : i32
    %c0_i32_1 = arith.constant 0 : i32
    return %c0_i32, %c0_i32_0 : i32, i32
  }
  func.func @transform_3(%arg0: i32) -> (i32, i32) {
    %c0_i32 = arith.constant 0 : i32
    %c0_i32_0 = arith.constant 0 : i32
    return %arg0, %c0_i32 : i32, i32
  }
  func.func @transform_4(%arg0: i32) -> (i32, i32) {
    %c0_i32 = arith.constant 0 : i32
    %c0_i32_0 = arith.constant 0 : i32
    return %arg0, %c0_i32 : i32, i32
  }
}

</mosaic_0001>

<bundles_post_ra>
// kernel: tpu_custom_call.1
= control target key start
LH: loop header
LB: loop body
LE: loop exit
PB: predicated region body
PF: predicated region fallthrough
CT: control target
= control target key end

     0   :  { %10 = vsyncpa [#allocation3], 0  ;;  %vm28_vm0 = vcmask 261120   ;;  %s374_s0 = inlined_call_operand.vmem [shape: f32[16,32], index: 0, kind: input, shape index: {}]   ;;  %s375_s1 = inlined_call_operand.vmem [shape: f32[64,32], index: 1, kind: input, shape index: {}]   ;;  %s376_s2 = inlined_call_operand.vmem [shape: f32[1,64], index: 2, kind: input, shape index: {}]   ;;  %s377_s3 = inlined_call_operand.hbm [shape: f32[16,32], index: 3, kind: output, shape index: {0}]   ;;  %s378_s4 = inlined_call_operand.hbm [shape: f32[8,128], index: 4, kind: output, shape index: {1}]  }
   0x1   :  { %v27_v0 = vld [vmem:[%s375_s1 + $0x38] sm:$0xff]  ;;  %v26_v1 = vld [vmem:[%s375_s1 + $0x30] sm:$0xff] }
   0x2   :  { %199 = vmatpush.xpose.msk.msra.mxu0 %vm28_vm0, %v27_v0  ;;  %211 = vmatpush.xpose.msk.msra.mxu2 %vm28_vm0, %v27_v0 }
   0x3   :  { %115 = vmatpush.msra.mxu1 %v27_v0 }
   0x4   :  { %11 = vsyncpa [#allocation5], 0  ;;  %v25_v2 = vld [vmem:[%s375_s1 + $0x28] sm:$0xff]  ;;  %v24_v3 = vld [vmem:[%s375_s1 + $0x20] sm:$0xff]  ;;  %vm88_vm1 = vcmask 523264   ;;  %v95_v17 = vlaneseq  ;;  %v279_v20 = vmov 0.0  }
   0x5   :  { %116 = vmatpush.msra.mxu1 %v26_v1  ;;  %v23_v4 = vld [vmem:[%s375_s1 + $0x18] sm:$0xff]  ;;  %v22_v5 = vld [vmem:[%s375_s1 + $0x10] sm:$0xff]  ;;  %v21_v6 = vld [vmem:[%s375_s1 + $0x8] sm:$0xff]  ;;  %s171_s12 = sshll.u32 %s377_s3, 4  ;;  %s281_s13 = smov 128   ;;  %s172_s12 = int_to_ptr.hbm [resolvable:$true] %s171_s12 }
   0x6   :  { %200 = vmatpush.xpose.msk.msra.mxu0 %vm28_vm0, %v26_v1  ;;  %212 = vmatpush.xpose.msk.msra.mxu2 %vm28_vm0, %v26_v1  ;;  %v20_v7 = vld [vmem:[%s375_s1] sm:$0xff]  ;;  %v19_v9 = vld [vmem:[%s374_s0 + $0x8] sm:$0xff]  ;;  %v96_v18 = vand.u32 127, %v95_v17  ;;  %s282_s14 = smov 8   ;;  %s283_s15 = smov [#allocation4]  }
   0x7   :  { %117 = vmatpush.msra.mxu1 %v25_v2  ;;  %v18_v8 = vld [vmem:[%s374_s0] sm:$0xff]  ;;  %s280_s0 = smov [#allocation2]   ;;  %s183_s16 = sshll.u32 %s283_s15, 4  ;;  %s184_s16 = int_to_ptr.vmem [resolvable:$true] %s183_s16 }
   0x8   :  { %v226_v10 = vld [vmem:[%s376_s2] ss:$0 sm:$0xff]  ;;  %s169_s2 = sshll.u32 %s280_s0, 4  ;;  %s185_s19 = sshll.u32 %s378_s4, 4  ;;  %s170_s2 = int_to_ptr.vmem [resolvable:$true] %s169_s2  ;;  %s186_s19 = int_to_ptr.hbm [resolvable:$true] %s185_s19 }
   0x9   :  { %118 = vmatpush.msra.mxu1 %v24_v3 }
   0xa   :  { %201 = vmatpush.xpose.msk.msra.mxu0 %vm28_vm0, %v25_v2  ;;  %213 = vmatpush.xpose.msk.msra.mxu2 %vm28_vm0, %v25_v2 }
   0xb   :  { %119 = vmatpush.msra.mxu1 %v23_v4 }
   0xd   :  { %120 = vmatpush.msra.mxu1 %v22_v5 }
   0xe   :  { %202 = vmatpush.xpose.msk.msra.mxu0 %vm28_vm0, %v24_v3  ;;  %214 = vmatpush.xpose.msk.msra.mxu2 %vm28_vm0, %v24_v3 }
   0xf   :  { %121 = vmatpush.msra.mxu1 %v21_v6 }
  0x11   :  { %122 = vmatpush.msra.mxu1 %v20_v7 }
  0x12   :  { %203 = vmatpush.xpose.msk.msra.mxu0 %vm28_vm0, %v23_v4  ;;  %215 = vmatpush.xpose.msk.msra.mxu2 %vm28_vm0, %v23_v4 }
  0x16   :  { %204 = vmatpush.xpose.msk.msra.mxu0 %vm28_vm0, %v22_v5  ;;  %216 = vmatpush.xpose.msk.msra.mxu2 %vm28_vm0, %v22_v5 }
  0x1a   :  { %205 = vmatpush.xpose.msk.msra.mxu0 %vm28_vm0, %v21_v6  ;;  %217 = vmatpush.xpose.msk.msra.mxu2 %vm28_vm0, %v21_v6 }
  0x1e   :  { %206 = vmatpush.xpose.msk.msra.mxu0 %vm28_vm0, %v20_v7  ;;  %218 = vmatpush.xpose.msk.msra.mxu2 %vm28_vm0, %v20_v7 }
  0x21   :  { %207 = vmatmul.msk.f32.vlgmr.msra.gmra.mxu0 %vm28_vm0, %v18_v8  ;;  %208 = vmatmul.msk.f32.vlgmr.msra.gmra.mxu2 %vm28_vm0, %v19_v9 }
  0x9e   :  { %v76_v11 = vpop.f32.mrf.mxu0 }
  0x9f   :  { %v86_v12 = vadd.f32 %v226_v10, %v76_v11 }
  0xa1   :  { %v89_v13 = vsel %vm88_vm1, %v86_v12, inf }
  0xa2   :  { %90 = vmin.index.xlane.f32.xlu0 %v89_v13 }
  0xa4   :  { %v79_v14 = vpop.f32.mrf.mxu2 }
  0xa5   :  { %v87_v15 = vadd.f32 %v226_v10, %v79_v14 }
  0xa7   :  { %v92_v16 = vsel %vm88_vm1, %v87_v15, inf }
  0xaa   :  { %93 = vmin.index.xlane.f32.xlu0 %v92_v16 }
 0x115   :  { %v91_v19 = vpop.xlane.xlu0 %90 }
 0x116   :  { %vm97_vm2 = vcmp.eq.s32.totalorder %v96_v18, %v91_v19 }
 0x117   :  { %v99_v21 = vsel %vm97_vm2, -0.5, %v279_v20 }
 0x118   :  { %209 = vmatmul.msk.f32.vlgmr.msra.gmra.mxu1 %vm88_vm1, %v99_v21 }
 0x11d   :  { %v94_v22 = vpop.xlane.xlu0 %93 }
 0x11e   :  { %vm98_vm3 = vcmp.eq.s32.totalorder %v96_v18, %v94_v22 }
 0x11f   :  { %v100_v23 = vsel %vm98_vm3, -0.5, %v279_v20 }
 0x120   :  { %210 = vmatmul.msk.f32.gmra.mxu1 %vm88_vm1, %v100_v23 }
 0x195   :  { %v124_v24 = vpop.f32.mrf.mxu1 }
 0x196   :  { %130 = vst.msk [vmem:[#allocation2] sm:$0xff] %vm28_vm0, %v124_v24  ;;  %v141_v25 = vsub.f32 %v124_v24, %v18_v8 }
 0x198   :  { %v149_v27 = vmul.f32 %v141_v25, %v141_v25 }
 0x19a   :  { %v151_v30 = vsel %vm28_vm0, %v149_v27, 0.0 }
 0x19d   :  { %v127_v26 = vpop.f32.mrf.mxu1 }
 0x19e   :  { %131 = vst.msk [vmem:[#allocation2 + $0x8] sm:$0xff] %vm28_vm0, %v127_v26  ;;  %v142_v28 = vsub.f32 %v127_v26, %v19_v9 }
 0x19f   :  { %177 = dma.vmem_to_hbm [thread:$0]  %s170_s2, 256, %s172_s12, [#allocation3], %s281_s13, %s281_s13, %s282_s14  }
 0x1a0   :  { %v150_v29 = vmul.f32 %v142_v28, %v142_v28 }
 0x1a2   :  { %v152_v31 = vsel %vm28_vm0, %v150_v29, 0.0 }
 0x1a3   :  { %v153_v32 = vadd.f32 %v152_v31, %v151_v30 }
 0x1a5   :  { %154 = vadd.xlane.f32.xlu1 %v153_v32 }
 0x218   :  { %v155_v33 = vpop.xlane.xlu1 %154 }
 0x219   :  { %v156_v34 = vrot.slane %v155_v33, 4 }
 0x21b   :  { %v157_v35 = vadd.f32 %v156_v34, %v155_v33 }
 0x21d   :  { %v158_v36 = vrot.slane %v157_v35, 2 }
 0x21f   :  { %v159_v37 = vadd.f32 %v158_v36, %v157_v35 }
 0x221   :  { %v160_v38 = vrot.slane %v159_v37, 1 }
 0x223   :  { %v161_v39 = vadd.f32 %v160_v38, %v159_v37 }
 0x225   :  { %219 = vpush %v161_v39 }
 0x256   :  { %s220_s3 = spop %219 }
 0x257   :  { %v163_v40 = vstv %s220_s3 }
 0x258   :  { %164 = vst [vmem:[#allocation4] sm:$0xff] %v163_v40 }
 0x259   :  { %188 = dma.vmem_to_hbm [thread:$0]  %s184_s16, 128, %s186_s19, [#allocation5]  }
 0x25a   :  { %275 = dma.done.wait [#allocation3], 256  }
 0x25b   :  { %276 = vsyncadd [#allocation3], 4294967040 }
 0x25c   :  { %277 = dma.done.wait [#allocation5], 128  }
 0x25d   :  { %278 = vsyncadd [#allocation5], 4294967168 }
 0x25e   :  { %197 = vsyncpa [#allocation3], 1 }
 0x25f   :  { %198 = vsyncpa [#allocation5], 1 }

</bundles_post_ra>
